<compile_context>
chip_gen: v6e
topology: v6e:2x2x1
jax: 0.10.0
libtpu: 0.0.40
codegen_flags: <defaults>
</compile_context>

<pallas_src>
import functools

import jax
import jax.numpy as jnp
from jax.experimental import pallas as pl
from jax.experimental.pallas import tpu as pltpu


def _mlp_kernel(x_ref, w1_ref, b1_ref, w2_ref, b2_ref, w3_ref, b3_ref, o_ref,
                *, binary: bool, last_layer_is_vector: bool, matmul_dtype=None):
    def mm(a, w_ref):
        w = w_ref[...]
        if matmul_dtype is not None:
            a = a.astype(matmul_dtype)
            w = w.astype(matmul_dtype)
        return jnp.dot(a, w, preferred_element_type=jnp.float32)

    # Layer 1: Linear(in -> h1)   (Dropout after it is identity at eval time)
    h = mm(x_ref[...], w1_ref) + b1_ref[...]
    # Layer 2: Linear(h1 -> h2)   (Dropout after it is identity at eval time)
    h = mm(h, w2_ref) + b2_ref[...]
    # Layer 3: Linear(h2 -> out)
    if last_layer_is_vector:
        # out_features == 1: VPU multiply + lane reduce; skip a 1/256th-width MXU pass.
        # w3_ref holds the weight as a (1, K) row.
        h = jnp.sum(h * w3_ref[...], axis=-1, keepdims=True) + b3_ref[...]
    else:
        h = mm(h, w3_ref) + b3_ref[...]
    if binary:
        h = jax.nn.sigmoid(h)  # exp lands on the EUP slot
    o_ref[...] = h.astype(o_ref.dtype)
    # TODO(synk): training-mode nn.Dropout (stochastic masking via pltpu.prng_random_bits)
    # is not implemented; this kernel is the eval/inference forward pass.


def base_model_forward(x, params, mode='binary', *, block_batch=8192,
                       matmul_dtype=None):
    """Pallas forward pass equivalent to BaseModel.forward with fc layers."""
    (w1, b1), (w2, b2), (w3, b3) = params
    batch, in_dim = x.shape
    out_dim = w3.shape[1]

    # Biases as (1, out) rows so they broadcast along the batch (sublane) axis.
    b1r = b1.reshape(1, -1)
    b2r = b2.reshape(1, -1)
    b3r = b3.reshape(1, -1)

    # Degenerate (K, 1) last layer -> pass as a (1, K) row for the VPU path.
    last_is_vector = (out_dim == 1)
    w3k = w3.reshape(1, -1) if last_is_vector else w3

    # Batch tiling: stream x/out, keep weights resident.
    if batch <= block_batch:
        tb = batch                      # single full-extent tile
        padded = batch
    else:
        tb = int(block_batch)
        padded = ((batch + tb - 1) // tb) * tb
    xp = x if padded == batch else jnp.pad(x, ((0, padded - batch), (0, 0)))
    grid = (padded // tb,)

    def resident(a):
        zeros = (0,) * a.ndim
        return pl.BlockSpec(a.shape, lambda i: zeros)

    kernel = functools.partial(
        _mlp_kernel,
        binary=(mode == 'binary'),
        last_layer_is_vector=last_is_vector,
        matmul_dtype=matmul_dtype,
    )

    out = pl.pallas_call(
        kernel,
        out_shape=jax.ShapeDtypeStruct((padded, out_dim), x.dtype),
        grid=grid,
        in_specs=[
            pl.BlockSpec((tb, in_dim), lambda i: (i, 0)),   # streamed activations
            resident(w1), resident(b1r),
            resident(w2), resident(b2r),
            resident(w3k), resident(b3r),
        ],
        out_specs=pl.BlockSpec((tb, out_dim), lambda i: (i, 0)),
        compiler_params=pltpu.CompilerParams(
            dimension_semantics=("parallel",),       # megacore sharding on v7x
            vmem_limit_bytes=32 * 1024 * 1024,       # usage is ~2-3 MiB even at TB=8192
        ),
    )(xp, w1, b1r, w2, b2r, w3k, b3r)

    return out if padded == batch else out[:batch]


def init_params(key, layers):
    """Deterministic init mirroring _add_fc_layers(layers=[...]): Linear stack."""
    params = []
    for i in range(len(layers) - 1):
        key, kw, kb = jax.random.split(key, 3)
        fan_in = layers[i]
        bound = 1.0 / jnp.sqrt(fan_in)
        w = jax.random.uniform(kw, (layers[i], layers[i + 1]),
                               minval=-bound, maxval=bound, dtype=jnp.float32)
        b = jax.random.uniform(kb, (layers[i + 1],),
                               minval=-bound, maxval=bound, dtype=jnp.float32)
        params.append((w, b))
    return params


def reference_forward(x, params, mode='binary'):
    h = x
    for (w, b) in params:
        h = h @ w + b
    if mode == 'binary':
        h = jax.nn.sigmoid(h)
    return h


if __name__ == "__main__":
    key = jax.random.PRNGKey(0)

    # MLP consistent with _add_fc_layers: layers = [32, 64, 16, 1]
    layers = [32, 64, 16, 1]

    kx1, kx2, kp = jax.random.split(key, 3)
    params = init_params(kp, layers)

    # Case 1: tiny batch -> single full-extent tile, binary mode (sigmoid).
    x_small = jax.random.normal(kx1, (8, layers[0]), dtype=jnp.float32)
    out_small = jax.block_until_ready(
        base_model_forward(x_small, params, mode='binary'))
    ref_small = reference_forward(x_small, params, mode='binary')
    assert out_small.shape == (8, 1), out_small.shape
    assert jnp.allclose(out_small, ref_small, atol=1e-5, rtol=1e-5), \
        "binary/small mismatch vs reference"

    # Case 1b: linear mode (no sigmoid) on the same batch.
    out_lin = jax.block_until_ready(
        base_model_forward(x_small, params, mode='linear'))
    ref_lin = reference_forward(x_small, params, mode='linear')
    assert jnp.allclose(out_lin, ref_lin, atol=1e-5, rtol=1e-5), \
        "linear mismatch vs reference"

    # Case 2: batch > tile -> multi-step grid (weights resident, x/out streamed),
    # non-divisible batch exercises the padding path.
    x_big = jax.random.normal(kx2, (200, layers[0]), dtype=jnp.float32)
    out_big = jax.block_until_ready(
        base_model_forward(x_big, params, mode='binary', block_batch=128))
    ref_big = reference_forward(x_big, params, mode='binary')
    assert out_big.shape == (200, 1), out_big.shape
    assert jnp.allclose(out_big, ref_big, atol=1e-5, rtol=1e-5), \
        "binary/tiled mismatch vs reference"

    # Case 3: bf16 MXU inputs (v6e/v7x fast path), f32 accumulate. Looser tolerance.
    out_bf16 = jax.block_until_ready(
        base_model_forward(x_big, params, mode='binary', block_batch=128,
                           matmul_dtype=jnp.bfloat16))
    assert out_bf16.shape == (200, 1), out_bf16.shape
    assert jnp.all(jnp.isfinite(out_bf16))
    assert jnp.allclose(out_bf16, ref_big, atol=5e-2), \
        "bf16 path diverged too far from f32 reference"

    print("KERNEL_OK")
</pallas_src>

<mosaic_0001>
module attributes {stable_mosaic.version = 11 : i64} {
  func.func @_mlp_kernel(%arg0: i32, %arg1: memref<8x32xf32, #tpu.memory_space<vmem>>, %arg2: memref<32x64xf32, #tpu.memory_space<vmem>>, %arg3: memref<1x64xf32, #tpu.memory_space<vmem>>, %arg4: memref<64x16xf32, #tpu.memory_space<vmem>>, %arg5: memref<1x16xf32, #tpu.memory_space<vmem>>, %arg6: memref<1x16xf32, #tpu.memory_space<vmem>>, %arg7: memref<1x1xf32, #tpu.memory_space<vmem>>, %arg8: memref<8x1xf32, #tpu.memory_space<vmem>>) attributes {dimension_semantics = [#tpu.dimension_semantics<parallel>], iteration_bounds = array<i64: 1>, scalar_prefetch = 0 : i64, scratch_operands = 0 : i64, tpu.core_type = #tpu.core_type<tc>, window_params = [{transform_indices = @transform_0, window_bounds = array<i64: 8, 32>}, {pipeline_mode = #tpu.pipeline_mode<synchronous>, transform_indices = @transform_1, window_bounds = array<i64: 32, 64>}, {pipeline_mode = #tpu.pipeline_mode<synchronous>, transform_indices = @transform_2, window_bounds = array<i64: 1, 64>}, {pipeline_mode = #tpu.pipeline_mode<synchronous>, transform_indices = @transform_3, window_bounds = array<i64: 64, 16>}, {pipeline_mode = #tpu.pipeline_mode<synchronous>, transform_indices = @transform_4, window_bounds = array<i64: 1, 16>}, {pipeline_mode = #tpu.pipeline_mode<synchronous>, transform_indices = @transform_5, window_bounds = array<i64: 1, 16>}, {pipeline_mode = #tpu.pipeline_mode<synchronous>, transform_indices = @transform_6, window_bounds = array<i64: 1, 1>}, {transform_indices = @transform_7, window_bounds = array<i64: 8, 1>}]} {
    %c0 = arith.constant 0 : index
    %c0_0 = arith.constant 0 : index
    %0 = vector.load %arg1[%c0, %c0_0] : memref<8x32xf32, #tpu.memory_space<vmem>>, vector<8x32xf32>
    %c0_1 = arith.constant 0 : index
    %c0_2 = arith.constant 0 : index
    %1 = vector.load %arg2[%c0_1, %c0_2] : memref<32x64xf32, #tpu.memory_space<vmem>>, vector<32x64xf32>
    %cst = arith.constant dense<0.000000e+00> : vector<8x64xf32>
    %2 = tpu.matmul %0, %1, %cst {dimension_numbers = #tpu.dot_dimension_numbers<[1], [0], [0], [1], [0, 0, 1, 1], [], []>} : vector<8x32xf32>, vector<32x64xf32>, vector<8x64xf32> -> vector<8x64xf32>
    %c0_3 = arith.constant 0 : index
    %c0_4 = arith.constant 0 : index
    %3 = vector.load %arg3[%c0_3, %c0_4] : memref<1x64xf32, #tpu.memory_space<vmem>>, vector<1x64xf32>
    %4 = vector.broadcast %3 : vector<1x64xf32> to vector<8x64xf32>
    %5 = arith.addf %2, %4 : vector<8x64xf32>
    %c0_5 = arith.constant 0 : index
    %c0_6 = arith.constant 0 : index
    %6 = vector.load %arg4[%c0_5, %c0_6] : memref<64x16xf32, #tpu.memory_space<vmem>>, vector<64x16xf32>
    %cst_7 = arith.constant dense<0.000000e+00> : vector<8x16xf32>
    %7 = tpu.matmul %5, %6, %cst_7 {dimension_numbers = #tpu.dot_dimension_numbers<[1], [0], [0], [1], [0, 0, 1, 1], [], []>} : vector<8x64xf32>, vector<64x16xf32>, vector<8x16xf32> -> vector<8x16xf32>
    %c0_8 = arith.constant 0 : index
    %c0_9 = arith.constant 0 : index
    %8 = vector.load %arg5[%c0_8, %c0_9] : memref<1x16xf32, #tpu.memory_space<vmem>>, vector<1x16xf32>
    %9 = vector.broadcast %8 : vector<1x16xf32> to vector<8x16xf32>
    %10 = arith.addf %7, %9 : vector<8x16xf32>
    %c0_10 = arith.constant 0 : index
    %c0_11 = arith.constant 0 : index
    %11 = vector.load %arg6[%c0_10, %c0_11] : memref<1x16xf32, #tpu.memory_space<vmem>>, vector<1x16xf32>
    %12 = vector.broadcast %11 : vector<1x16xf32> to vector<8x16xf32>
    %13 = arith.mulf %10, %12 : vector<8x16xf32>
    %cst_12 = arith.constant dense<0.000000e+00> : vector<8xf32>
    %14 = vector.multi_reduction <add>, %13, %cst_12 [1] : vector<8x16xf32> to vector<8xf32>
    %15 = vector.shape_cast %14 : vector<8xf32> to vector<8x1xf32>
    %c0_13 = arith.constant 0 : index
    %c0_14 = arith.constant 0 : index
    %16 = vector.load %arg7[%c0_13, %c0_14] : memref<1x1xf32, #tpu.memory_space<vmem>>, vector<1x1xf32>
    %17 = vector.broadcast %16 : vector<1x1xf32> to vector<8x1xf32>
    %18 = arith.addf %15, %17 : vector<8x1xf32>
    %19 = arith.negf %18 : vector<8x1xf32>
    %20 = math.exp %19 : vector<8x1xf32>
    %cst_15 = arith.constant 1.000000e+00 : f32
    %21 = vector.broadcast %cst_15 : f32 to vector<8x1xf32>
    %22 = arith.addf %21, %20 : vector<8x1xf32>
    %23 = arith.divf %21, %22 : vector<8x1xf32>
    %c0_16 = arith.constant 0 : index
    %c0_17 = arith.constant 0 : index
    %24 = vector.load %arg8[%c0_16, %c0_17] : memref<8x1xf32, #tpu.memory_space<vmem>>, vector<8x1xf32>
    tpu.vector_store %arg8[%c0_16, %c0_17], %23 {strides = array<i32>} : memref<8x1xf32, #tpu.memory_space<vmem>>, vector<8x1xf32>,
    return
  }
  func.func @transform_0(%arg0: i32) -> (i32, i32) {
    %c0_i32 = arith.constant 0 : i32
    %c0_i32_0 = arith.constant 0 : i32
    return %arg0, %c0_i32 : i32, i32
  }
  func.func @transform_1(%arg0: i32) -> (i32, i32) {
    %c0_i32 = arith.constant 0 : i32
    %c0_i32_0 = arith.constant 0 : i32
    %c0_i32_1 = arith.constant 0 : i32
    return %c0_i32, %c0_i32_0 : i32, i32
  }
  func.func @transform_2(%arg0: i32) -> (i32, i32) {
    %c0_i32 = arith.constant 0 : i32
    %c0_i32_0 = arith.constant 0 : i32
    %c0_i32_1 = arith.constant 0 : i32
    return %c0_i32, %c0_i32_0 : i32, i32
  }
  func.func @transform_3(%arg0: i32) -> (i32, i32) {
    %c0_i32 = arith.constant 0 : i32
    %c0_i32_0 = arith.constant 0 : i32
    %c0_i32_1 = arith.constant 0 : i32
    return %c0_i32, %c0_i32_0 : i32, i32
  }
  func.func @transform_4(%arg0: i32) -> (i32, i32) {
    %c0_i32 = arith.constant 0 : i32
    %c0_i32_0 = arith.constant 0 : i32
    %c0_i32_1 = arith.constant 0 : i32
    return %c0_i32, %c0_i32_0 : i32, i32
  }
  func.func @transform_5(%arg0: i32) -> (i32, i32) {
    %c0_i32 = arith.constant 0 : i32
    %c0_i32_0 = arith.constant 0 : i32
    %c0_i32_1 = arith.constant 0 : i32
    return %c0_i32, %c0_i32_0 : i32, i32
  }
  func.func @transform_6(%arg0: i32) -> (i32, i32) {
    %c0_i32 = arith.constant 0 : i32
    %c0_i32_0 = arith.constant 0 : i32
    %c0_i32_1 = arith.constant 0 : i32
    return %c0_i32, %c0_i32_0 : i32, i32
  }
  func.func @transform_7(%arg0: i32) -> (i32, i32) {
    %c0_i32 = arith.constant 0 : i32
    %c0_i32_0 = arith.constant 0 : i32
    return %arg0, %c0_i32 : i32, i32
  }
}

</mosaic_0001>

<bundles_post_ra>
// kernel: tpu_custom_call.1
= control target key start
LH: loop header
LB: loop body
LE: loop exit
PB: predicated region body
PF: predicated region fallthrough
CT: control target
= control target key end

     0   :  { %v292_v0 = vmov 0.0   ;;  %vm293_vm0 = vmmov 0   ;;  %vm40_vm1 = vcmask 261120   ;;  %vm129_vm2 = vcmask 523264   ;;  %s390_s1 = inlined_call_operand.vmem [shape: f32[32,64], index: 1, kind: input, shape index: {}]   ;;  %s391_s3 = inlined_call_operand.vmem [shape: f32[64,16], index: 3, kind: input, shape index: {}]   ;;  %s392_s0 = inlined_call_operand.vmem [shape: f32[8,32], index: 0, kind: input, shape index: {}]   ;;  %s393_s2 = inlined_call_operand.vmem [shape: f32[1,64], index: 2, kind: input, shape index: {}]   ;;  %s394_s6 = inlined_call_operand.<no memory space> [shape: f32[1,1], index: 6, kind: input, shape index: {}]   ;;  %s395_s4 = inlined_call_operand.vmem [shape: f32[1,16], index: 4, kind: input, shape index: {}]   ;;  %s396_s5 = inlined_call_operand.vmem [shape: f32[1,16], index: 5, kind: input, shape index: {}]   ;;  %s397_s7 = inlined_call_operand.vmem [shape: f32[8,1], index: 7, kind: output, shape index: {}]  }
   0x1   :  { %256 = vmatprep.subr.mxu0 %v292_v0  ;;  %v32_v1 = vld [vmem:[%s390_s1 + $0x18] sm:$0xff]  ;;  %v31_v2 = vld [vmem:[%s390_s1 + $0x10] sm:$0xff]  ;;  %264 = vmatprep.mubr.msk.f32.mxu0 %vm293_vm0, %v292_v0  ;;  %v30_v4 = vld [vmem:[%s390_s1 + $0x8] sm:$0xff]  ;;  %v12_v18 = vstv %s394_s6  ;;  %vm211_vm3 = vcmask 130048   ;;  %vm229_vm4 = vcmask 7168  }
   0x2   :  { %257 = vmatpush3.msra.mxu0 %v32_v1  ;;  %267 = vmatprep.subr.mxu1 %v292_v0  ;;  %v121_v3 = vld [vmem:[%s391_s3 + $0x38] sm:$0xff]  ;;  %v120_v5 = vld [vmem:[%s391_s3 + $0x30] sm:$0xff]  ;;  %v119_v6 = vld [vmem:[%s391_s3 + $0x28] sm:$0xff]  ;;  %13 = vst [vmem:[#allocation2] sm:$0x1] %v12_v18 }
   0x3   :  { %258 = vmatprep.subr.mxu0 %v292_v0  ;;  %268 = vmatpush3.msra.mxu1 %v121_v3  ;;  %v29_v7 = vld [vmem:[%s390_s1] sm:$0xff]  ;;  %v117_v10 = vld [vmem:[%s391_s3 + $0x18] sm:$0xff]  ;;  %v116_v11 = vld [vmem:[%s391_s3 + $0x10] sm:$0xff] }
   0x4   :  { %259 = vmatpush3.msra.mxu0 %v31_v2  ;;  %269 = vmatprep.subr.mxu1 %v292_v0  ;;  %v28_v8 = vld [vmem:[%s392_s0] sm:$0xff]  ;;  %v115_v12 = vld [vmem:[%s391_s3 + $0x8] sm:$0xff] }
   0x5   :  { %260 = vmatprep.subr.mxu0 %v292_v0  ;;  %270 = vmatpush3.msra.mxu1 %v120_v5  ;;  %v118_v9 = vld [vmem:[%s391_s3 + $0x20] sm:$0xff] }
   0x6   :  { %261 = vmatpush3.msra.mxu0 %v30_v4  ;;  %271 = vmatprep.subr.mxu1 %v292_v0  ;;  %v114_v13 = vld [vmem:[%s391_s3] sm:$0xff] }
   0x7   :  { %262 = vmatprep.subr.mxu0 %v292_v0  ;;  %272 = vmatpush3.msra.mxu1 %v119_v6  ;;  %v235_v14 = vld [vmem:[%s393_s2] ss:$0 sm:$0xff] }
   0x8   :  { %263 = vmatpush3.msra.mxu0 %v29_v7  ;;  %273 = vmatprep.subr.mxu1 %v292_v0  ;;  %v237_v19 = vld [vmem:[%s395_s4] ss:$0 sm:$0xff] }
   0x9   :  { %265 = vmatmul.mubr.msk.f32.vlgmr.msra.gmra.mxu0 %vm40_vm1, %v28_v8  ;;  %274 = vmatpush3.msra.mxu1 %v118_v9  ;;  %v239_v21 = vld [vmem:[%s396_s5] ss:$0 sm:$0xff] }
   0xa   :  { %275 = vmatprep.subr.mxu1 %v292_v0  ;;  %283 = vmatprep.mubr.msk.f32.mxu1 %vm293_vm0, %v292_v0  ;;  %v240_v26 = vld [vmem:[#allocation2] ss:$0 sm:$0xff] }
   0xb   :  { %276 = vmatpush3.msra.mxu1 %v117_v10 }
   0xc   :  { %277 = vmatprep.subr.mxu1 %v292_v0 }
   0xd   :  { %278 = vmatpush3.msra.mxu1 %v116_v11 }
   0xe   :  { %279 = vmatprep.subr.mxu1 %v292_v0 }
   0xf   :  { %280 = vmatpush3.msra.mxu1 %v115_v12 }
  0x10   :  { %281 = vmatprep.subr.mxu1 %v292_v0 }
  0x11   :  { %282 = vmatpush3.msra.mxu1 %v114_v13 }
  0xc9   :  { %v110_v15 = vpop.f32.mrf.mxu0 }
  0xca   :  { %v111_v16 = vadd.f32 %v235_v14, %v110_v15 }
  0xcb   :  { %v266_v17 = vpop.f32.mrf.mxu0 }
  0xcc   :  { %284 = vmatmul.mubr.msk.f32.vlgmr.msra.gmra.mxu1 %vm129_vm2, %v111_v16 }
 0x18c   :  { %v199_v20 = vpop.f32.mrf.mxu1 }
 0x18d   :  { %v200_v22 = vadd.f32 %v237_v19, %v199_v20 }
 0x18e   :  { %v285_v23 = vpop.f32.mrf.mxu1 }
 0x18f   :  { %v210_v24 = vmul.f32 %v239_v21, %v200_v22 }
 0x191   :  { %v212_v25 = vsel %vm211_vm3, %v210_v24, 0.0 }
 0x192   :  { %213 = vadd.xlane.f32.xlu0 %v212_v25 }
 0x21b   :  { %v214_v27 = vpop.xlane.xlu0 %213 }
 0x21c   :  { %v222_v28 = vadd.f32 %v240_v26, %v214_v27 }
 0x21e   :  { %v241_v29 = vmul.f32 -1.442695, %v222_v28 }
 0x220   :  { %288 = vpow2.f32 %v241_v29 }
 0x22d   :  { %v289_v30 = vpop.eup %288 }
 0x22e   :  { %v226_v31 = vadd.f32 1.0, %v289_v30 }
 0x230   :  { %290 = vrcp.f32 %v226_v31 }
 0x23d   :  { %v291_v32 = vpop.eup %290 }
 0x23e   :  { %230 = vst.msk [vmem:[%s397_s7] sm:$0xff] %vm229_vm4, %v291_v32 }

</bundles_post_ra>
